<compile_context>
chip_gen: v5e
topology: v5e:2x2
jax: 0.10.0
libtpu: 0.0.40
codegen_flags: <defaults>
</compile_context>

<pallas_src>
import functools
import math
import numpy as np
import jax
import jax.numpy as jnp
from jax.experimental import pallas as pl
from jax.experimental.pallas import tpu as pltpu


def _make_block_kernel(B, C, F, K, pad, mm_dtype):
    BC = B * C
    inv_n = 1.0 / (B * F)              # BN normalizer: per-channel count over (batch, feature)
    pow2_C = (C & (C - 1)) == 0

    def kernel(x_ref, w1_ref, bn_ref, w2_ref, o_ref):
        # Frame index of every row (row r belongs to frame r % C), built in-kernel so it
        # costs zero DMAs.  C is typically a power of two -> bitwise AND.
        rows = jax.lax.broadcasted_iota(jnp.int32, (BC, 1), 0)
        cidx = (rows & (C - 1)) if pow2_C else (rows % C)

        # Per-offset validity masks as f32 0/1 multipliers, computed once and reused by
        # both conv layers.  Rows whose source frame falls outside [0, C) are zeroed;
        # conv zero-padding rows and rows that wrapped across a batch boundary are the
        # same rows, so one mask per offset handles both.
        masks = {}
        for k in range(K):
            off = k - pad
            if off != 0 and off not in masks:
                masks[off] = ((cidx + off >= 0) & (cidx + off < C)).astype(jnp.float32)

        def conv(inp, w_ref):
            # K small MXU matmuls, one per tap: (BC, Din) @ (Din, F).  Each result already
            # sits on lanes [0, F), so no sub-vreg lane slicing is needed before the taps
            # are summed; the frame shift is a sublane roll (XLU) + mask multiply (VPU).
            inp = inp.astype(mm_dtype)
            acc = None
            for k in range(K):                                   # static unroll over taps
                off = k - pad
                yk = jnp.dot(inp, w_ref[k], preferred_element_type=jnp.float32)
                if off != 0:
                    yk = pltpu.roll(yk, shift=(-off) % BC, axis=0) * masks[off]
                acc = yk if acc is None else acc + yk
            return acc                                           # (BC, F) f32

        def bn_lrelu(y, g, b):
            # Training-mode BatchNorm1d: per-channel stats over (batch, feature).
            # One pass: lane-reduce sum and sum-of-squares, stack them into a (BC, 2)
            # slab so the (B-1) stride-C sublane rolls that accumulate across the batch
            # are shared between the two statistics.
            rowsum = jnp.sum(y, axis=1, keepdims=True)           # (BC, 1)
            rowsq = jnp.sum(y * y, axis=1, keepdims=True)        # (BC, 1)
            stats = jnp.concatenate([rowsum, rowsq], axis=1)     # (BC, 2)
            tot = stats
            for j in range(1, B):                                # static unroll over batch
                tot = tot + pltpu.roll(stats, shift=(j * C) % BC, axis=0)
            mu = tot[:, 0:1] * inv_n                             # per-channel mean, per row
            var = tot[:, 1:2] * inv_n - mu * mu                  # E[y^2] - mu^2 (biased)
            z = (y - mu) * jax.lax.rsqrt(var + 1e-5) * g + b
            return jnp.where(z >= 0, z, 0.2 * z)                 # leaky_relu(0.2)

        y1 = bn_lrelu(conv(x_ref[...], w1_ref), bn_ref[0], bn_ref[1])
        y2 = bn_lrelu(conv(y1, w2_ref), bn_ref[2], bn_ref[3])
        o_ref[...] = y2.astype(o_ref.dtype)

    return kernel


def prepare_block_params(w1_torch, g1, b1, w2_torch, g2, b2, *, batch,
                         matmul_dtype=jnp.float32):
    """One-time (init-time) parameter formatting. Keep OFF the per-forward path.

    w1_torch : (F, D, K) Conv1d weight, torch layout (out, in, k), bias=False
    w2_torch : (F, F, K)
    g*/b*    : (C,)      BatchNorm1d affine params (num_features = input_channels = C)
    Returns a pytree {w1: (K,D,F), w2: (K,F,F), bn: (4, B*C, 1)} ready for block_forward.
    """
    def tap_weight(w):
        w = jnp.asarray(w, jnp.float32)                  # torch (F, Din, K)
        return jnp.transpose(w, (2, 1, 0)).astype(matmul_dtype)   # -> (K, Din, F)

    C = int(jnp.asarray(g1).shape[0])
    BC = batch * C

    def per_row(v):
        # BN affine param tiled to one value per (batch, frame) row: row r -> v[r % C].
        return jnp.tile(jnp.asarray(v, jnp.float32), batch).reshape(BC, 1)

    bn = jnp.stack([per_row(g1), per_row(b1), per_row(g2), per_row(b2)], axis=0)  # (4,BC,1)
    return {"w1": tap_weight(w1_torch), "w2": tap_weight(w2_torch), "bn": bn}


@functools.partial(jax.jit, static_argnames=("kernel_size",))
def block_forward(x, params, *, kernel_size):
    """Pallas forward of block(input_channels=C, input_dims=D, filters=F, kernel).

    x      : (B, C, D) float32
    params : output of prepare_block_params (matmul operand dtype is taken from params;
             bf16 operands + f32 accumulation are a good default on v5e/v6e/v7x alike).
    """
    B, C, D = x.shape
    K = kernel_size
    pad = math.ceil((K - 1) / 2)
    w1, w2, bn = params["w1"], params["w2"], params["bn"]
    F_ = int(w1.shape[2])
    BC = B * C
    mm_dtype = w1.dtype

    x2 = x.reshape(BC, D).astype(mm_dtype)               # matmul-only operand

    itm = jnp.dtype(mm_dtype).itemsize
    cost = pl.CostEstimate(
        flops=int(2 * BC * K * F_ * (D + F_) + 10 * BC * F_),     # two convs + BN/act
        transcendentals=int(2 * BC),                              # rsqrt per row per BN
        bytes_accessed=int(BC * D * itm + w1.size * itm + w2.size * itm
                           + bn.size * 4 + BC * F_ * 4),
    )

    vmem = pl.BlockSpec(memory_space=pltpu.MemorySpace.VMEM)
    out2 = pl.pallas_call(
        _make_block_kernel(B, C, F_, K, pad, mm_dtype),
        out_shape=jax.ShapeDtypeStruct((BC, F_), jnp.float32),
        in_specs=[vmem] * 4,
        out_specs=vmem,
        compiler_params=pltpu.CompilerParams(vmem_limit_bytes=32 * 1024 * 1024),
        cost_estimate=cost,
    )(x2, w1, bn, w2)

    return out2.reshape(B, C, F_)


# ---------------- pure-JAX reference (mirrors the PyTorch forward) ----------------
def _ref_c1d(x, w_torch, gamma, beta, kernel):
    pad = math.ceil((kernel - 1) / 2)
    xt = jnp.transpose(x, (0, 2, 1))                      # (B, D, C)  == x.permute(0,2,1)
    out = jax.lax.conv_general_dilated(
        xt, w_torch, window_strides=(1,), padding=[(pad, pad)],
        dimension_numbers=("NCH", "OIH", "NCH"))
    if kernel % 2 == 0:
        out = out[:, :, :-1]
    out = jnp.transpose(out, (0, 2, 1))                   # (B, C, F)
    mean = jnp.mean(out, axis=(0, 2), keepdims=True)      # training-mode BN batch stats
    var = jnp.mean((out - mean) ** 2, axis=(0, 2), keepdims=True)
    y = (out - mean) / jnp.sqrt(var + 1e-5)
    y = y * gamma.reshape(1, -1, 1) + beta.reshape(1, -1, 1)
    return jnp.where(y >= 0, y, 0.2 * y)


def _ref_block(x, w1, g1, b1, w2, g2, b2, kernel):
    y = _ref_c1d(x, w1, g1, b1, kernel)
    return _ref_c1d(y, w2, g2, b2, kernel)


if __name__ == "__main__":
    # block(input_channels=16, input_dims=32, filters=32, kernel=3)
    B, C, D, F_, K = 2, 16, 32, 32, 3
    key = jax.random.PRNGKey(0)
    kx, k1, k2, kg1, kb1, kg2, kb2 = jax.random.split(key, 7)

    x = jax.random.normal(kx, (B, C, D), jnp.float32)
    w1 = jax.random.normal(k1, (F_, D, K), jnp.float32) * (1.0 / math.sqrt(D * K))
    w2 = jax.random.normal(k2, (F_, F_, K), jnp.float32) * (1.0 / math.sqrt(F_ * K))
    g1 = 1.0 + 0.1 * jax.random.normal(kg1, (C,), jnp.float32)
    b1 = 0.1 * jax.random.normal(kb1, (C,), jnp.float32)
    g2 = 1.0 + 0.1 * jax.random.normal(kg2, (C,), jnp.float32)
    b2 = 0.1 * jax.random.normal(kb2, (C,), jnp.float32)

    ref = _ref_block(x, w1, g1, b1, w2, g2, b2, K)

    # f32 MXU operands (exact path) — tight tolerance.
    params_f32 = prepare_block_params(w1, g1, b1, w2, g2, b2, batch=B,
                                      matmul_dtype=jnp.float32)
    out_f32 = jax.block_until_ready(block_forward(x, params_f32, kernel_size=K))
    np.testing.assert_allclose(np.asarray(out_f32), np.asarray(ref), rtol=2e-3, atol=2e-3)

    # bf16 MXU operands with f32 accumulation (fast path on v5e/v6e/v7x) — looser tolerance.
    params_bf16 = prepare_block_params(w1, g1, b1, w2, g2, b2, batch=B,
                                       matmul_dtype=jnp.bfloat16)
    out_bf16 = jax.block_until_ready(block_forward(x, params_bf16, kernel_size=K))
    np.testing.assert_allclose(np.asarray(out_bf16), np.asarray(ref), rtol=5e-2, atol=5e-2)

    print("KERNEL_OK")
</pallas_src>

<mosaic_0001>
module attributes {stable_mosaic.version = 11 : i64} {
  func.func @kernel(%arg0: memref<32x32xf32, #tpu.memory_space<vmem>>, %arg1: memref<3x32x32xf32, #tpu.memory_space<vmem>>, %arg2: memref<4x32x1xf32, #tpu.memory_space<vmem>>, %arg3: memref<3x32x32xf32, #tpu.memory_space<vmem>>, %arg4: memref<32x32xf32, #tpu.memory_space<vmem>>) attributes {dimension_semantics = [], scalar_prefetch = 0 : i64, scratch_operands = 0 : i64, tpu.core_type = #tpu.core_type<tc>} {
    %0 = tpu.iota {dimensions = array<i32: 0>} : vector<32x1xi32>
    %c15_i32 = arith.constant 15 : i32
    %1 = vector.broadcast %c15_i32 : i32 to vector<32x1xi32>
    %2 = arith.andi %0, %1 : vector<32x1xi32>
    %c-1_i32 = arith.constant -1 : i32
    %3 = vector.broadcast %c-1_i32 : i32 to vector<32x1xi32>
    %4 = arith.addi %2, %3 : vector<32x1xi32>
    %c0_i32 = arith.constant 0 : i32
    %5 = vector.broadcast %c0_i32 : i32 to vector<32x1xi32>
    %6 = arith.cmpi sge, %4, %5 : vector<32x1xi32>
    %c-1_i32_0 = arith.constant -1 : i32
    %7 = vector.broadcast %c-1_i32_0 : i32 to vector<32x1xi32>
    %8 = arith.addi %2, %7 : vector<32x1xi32>
    %c16_i32 = arith.constant 16 : i32
    %9 = vector.broadcast %c16_i32 : i32 to vector<32x1xi32>
    %10 = arith.cmpi slt, %8, %9 : vector<32x1xi32>
    %11 = arith.andi %6, %10 : vector<32x1xi1>
    %12 = arith.extui %11 : vector<32x1xi1> to vector<32x1xi32>
    %13 = arith.sitofp %12 : vector<32x1xi32> to vector<32x1xf32>
    %c1_i32 = arith.constant 1 : i32
    %14 = vector.broadcast %c1_i32 : i32 to vector<32x1xi32>
    %15 = arith.addi %2, %14 : vector<32x1xi32>
    %c0_i32_1 = arith.constant 0 : i32
    %16 = vector.broadcast %c0_i32_1 : i32 to vector<32x1xi32>
    %17 = arith.cmpi sge, %15, %16 : vector<32x1xi32>
    %c1_i32_2 = arith.constant 1 : i32
    %18 = vector.broadcast %c1_i32_2 : i32 to vector<32x1xi32>
    %19 = arith.addi %2, %18 : vector<32x1xi32>
    %c16_i32_3 = arith.constant 16 : i32
    %20 = vector.broadcast %c16_i32_3 : i32 to vector<32x1xi32>
    %21 = arith.cmpi slt, %19, %20 : vector<32x1xi32>
    %22 = arith.andi %17, %21 : vector<32x1xi1>
    %23 = arith.extui %22 : vector<32x1xi1> to vector<32x1xi32>
    %24 = arith.sitofp %23 : vector<32x1xi32> to vector<32x1xf32>
    %c0 = arith.constant 0 : index
    %c0_4 = arith.constant 0 : index
    %25 = vector.load %arg0[%c0, %c0_4] : memref<32x32xf32, #tpu.memory_space<vmem>>, vector<32x32xf32>
    %c0_5 = arith.constant 0 : index
    %c0_6 = arith.constant 0 : index
    %c0_7 = arith.constant 0 : index
    %26 = vector.load %arg1[%c0_5, %c0_6, %c0_7] : memref<3x32x32xf32, #tpu.memory_space<vmem>>, vector<1x32x32xf32>
    %27 = vector.shape_cast %26 : vector<1x32x32xf32> to vector<32x32xf32>
    %cst = arith.constant dense<0.000000e+00> : vector<32x32xf32>
    %28 = tpu.matmul %25, %27, %cst {dimension_numbers = #tpu.dot_dimension_numbers<[1], [0], [0], [1], [0, 0, 1, 1], [], []>} : vector<32x32xf32>, vector<32x32xf32>, vector<32x32xf32> -> vector<32x32xf32>
    %c1_i32_8 = arith.constant 1 : i32
    %29 = tpu.dynamic_rotate %28 by %c1_i32_8 dim 0 : vector<32x32xf32>, i32 -> vector<32x32xf32>
    %30 = vector.broadcast %13 : vector<32x1xf32> to vector<32x32xf32>
    %31 = arith.mulf %29, %30 : vector<32x32xf32>
    %c1 = arith.constant 1 : index
    %c0_9 = arith.constant 0 : index
    %c0_10 = arith.constant 0 : index
    %32 = vector.load %arg1[%c1, %c0_9, %c0_10] : memref<3x32x32xf32, #tpu.memory_space<vmem>>, vector<1x32x32xf32>
    %33 = vector.shape_cast %32 : vector<1x32x32xf32> to vector<32x32xf32>
    %cst_11 = arith.constant dense<0.000000e+00> : vector<32x32xf32>
    %34 = tpu.matmul %25, %33, %cst_11 {dimension_numbers = #tpu.dot_dimension_numbers<[1], [0], [0], [1], [0, 0, 1, 1], [], []>} : vector<32x32xf32>, vector<32x32xf32>, vector<32x32xf32> -> vector<32x32xf32>
    %35 = arith.addf %31, %34 : vector<32x32xf32>
    %c2 = arith.constant 2 : index
    %c0_12 = arith.constant 0 : index
    %c0_13 = arith.constant 0 : index
    %36 = vector.load %arg1[%c2, %c0_12, %c0_13] : memref<3x32x32xf32, #tpu.memory_space<vmem>>, vector<1x32x32xf32>
    %37 = vector.shape_cast %36 : vector<1x32x32xf32> to vector<32x32xf32>
    %cst_14 = arith.constant dense<0.000000e+00> : vector<32x32xf32>
    %38 = tpu.matmul %25, %37, %cst_14 {dimension_numbers = #tpu.dot_dimension_numbers<[1], [0], [0], [1], [0, 0, 1, 1], [], []>} : vector<32x32xf32>, vector<32x32xf32>, vector<32x32xf32> -> vector<32x32xf32>
    %c31_i32 = arith.constant 31 : i32
    %39 = tpu.dynamic_rotate %38 by %c31_i32 dim 0 : vector<32x32xf32>, i32 -> vector<32x32xf32>
    %40 = vector.broadcast %24 : vector<32x1xf32> to vector<32x32xf32>
    %41 = arith.mulf %39, %40 : vector<32x32xf32>
    %42 = arith.addf %35, %41 : vector<32x32xf32>
    %c0_15 = arith.constant 0 : index
    %c0_16 = arith.constant 0 : index
    %c0_17 = arith.constant 0 : index
    %43 = vector.load %arg2[%c0_15, %c0_16, %c0_17] : memref<4x32x1xf32, #tpu.memory_space<vmem>>, vector<1x32x1xf32>
    %44 = vector.shape_cast %43 : vector<1x32x1xf32> to vector<32x1xf32>
    %c1_18 = arith.constant 1 : index
    %c0_19 = arith.constant 0 : index
    %c0_20 = arith.constant 0 : index
    %45 = vector.load %arg2[%c1_18, %c0_19, %c0_20] : memref<4x32x1xf32, #tpu.memory_space<vmem>>, vector<1x32x1xf32>
    %46 = vector.shape_cast %45 : vector<1x32x1xf32> to vector<32x1xf32>
    %cst_21 = arith.constant dense<0.000000e+00> : vector<32xf32>
    %47 = vector.multi_reduction <add>, %42, %cst_21 [1] : vector<32x32xf32> to vector<32xf32>
    %48 = vector.shape_cast %47 : vector<32xf32> to vector<32x1xf32>
    %49 = arith.mulf %42, %42 : vector<32x32xf32>
    %cst_22 = arith.constant dense<0.000000e+00> : vector<32xf32>
    %50 = vector.multi_reduction <add>, %49, %cst_22 [1] : vector<32x32xf32> to vector<32xf32>
    %51 = vector.shape_cast %50 : vector<32xf32> to vector<32x1xf32>
    %52 = tpu.concatenate %48, %51 in 1 : vector<32x1xf32>, vector<32x1xf32> -> vector<32x2xf32>
    %c16_i32_23 = arith.constant 16 : i32
    %53 = tpu.dynamic_rotate %52 by %c16_i32_23 dim 0 : vector<32x2xf32>, i32 -> vector<32x2xf32>
    %54 = arith.addf %52, %53 : vector<32x2xf32>
    %55 = vector.extract_strided_slice %54 {offsets = [0, 0], sizes = [32, 1], strides = [1, 1]} : vector<32x2xf32> to vector<32x1xf32>
    %cst_24 = arith.constant 1.562500e-02 : f32
    %56 = vector.broadcast %cst_24 : f32 to vector<32x1xf32>
    %57 = arith.mulf %55, %56 : vector<32x1xf32>
    %58 = vector.extract_strided_slice %54 {offsets = [0, 1], sizes = [32, 1], strides = [1, 1]} : vector<32x2xf32> to vector<32x1xf32>
    %cst_25 = arith.constant 1.562500e-02 : f32
    %59 = vector.broadcast %cst_25 : f32 to vector<32x1xf32>
    %60 = arith.mulf %58, %59 : vector<32x1xf32>
    %61 = arith.mulf %57, %57 : vector<32x1xf32>
    %62 = arith.subf %60, %61 : vector<32x1xf32>
    %63 = vector.broadcast %57 : vector<32x1xf32> to vector<32x32xf32>
    %64 = arith.subf %42, %63 : vector<32x32xf32>
    %cst_26 = arith.constant 9.99999974E-6 : f32
    %65 = vector.broadcast %cst_26 : f32 to vector<32x1xf32>
    %66 = arith.addf %62, %65 : vector<32x1xf32>
    %67 = math.rsqrt %66 : vector<32x1xf32>
    %68 = vector.broadcast %67 : vector<32x1xf32> to vector<32x32xf32>
    %69 = arith.mulf %64, %68 : vector<32x32xf32>
    %70 = vector.broadcast %44 : vector<32x1xf32> to vector<32x32xf32>
    %71 = arith.mulf %69, %70 : vector<32x32xf32>
    %72 = vector.broadcast %46 : vector<32x1xf32> to vector<32x32xf32>
    %73 = arith.addf %71, %72 : vector<32x32xf32>
    %cst_27 = arith.constant 0.000000e+00 : f32
    %74 = vector.broadcast %cst_27 : f32 to vector<32x32xf32>
    %75 = arith.cmpf oge, %73, %74 : vector<32x32xf32>
    %cst_28 = arith.constant 2.000000e-01 : f32
    %76 = vector.broadcast %cst_28 : f32 to vector<32x32xf32>
    %77 = arith.mulf %76, %73 : vector<32x32xf32>
    %78 = arith.select %75, %73, %77 : vector<32x32xi1>, vector<32x32xf32>
    %c0_29 = arith.constant 0 : index
    %c0_30 = arith.constant 0 : index
    %c0_31 = arith.constant 0 : index
    %79 = vector.load %arg3[%c0_29, %c0_30, %c0_31] : memref<3x32x32xf32, #tpu.memory_space<vmem>>, vector<1x32x32xf32>
    %80 = vector.shape_cast %79 : vector<1x32x32xf32> to vector<32x32xf32>
    %cst_32 = arith.constant dense<0.000000e+00> : vector<32x32xf32>
    %81 = tpu.matmul %78, %80, %cst_32 {dimension_numbers = #tpu.dot_dimension_numbers<[1], [0], [0], [1], [0, 0, 1, 1], [], []>} : vector<32x32xf32>, vector<32x32xf32>, vector<32x32xf32> -> vector<32x32xf32>
    %c1_i32_33 = arith.constant 1 : i32
    %82 = tpu.dynamic_rotate %81 by %c1_i32_33 dim 0 : vector<32x32xf32>, i32 -> vector<32x32xf32>
    %83 = vector.broadcast %13 : vector<32x1xf32> to vector<32x32xf32>
    %84 = arith.mulf %82, %83 : vector<32x32xf32>
    %c1_34 = arith.constant 1 : index
    %c0_35 = arith.constant 0 : index
    %c0_36 = arith.constant 0 : index
    %85 = vector.load %arg3[%c1_34, %c0_35, %c0_36] : memref<3x32x32xf32, #tpu.memory_space<vmem>>, vector<1x32x32xf32>
    %86 = vector.shape_cast %85 : vector<1x32x32xf32> to vector<32x32xf32>
    %cst_37 = arith.constant dense<0.000000e+00> : vector<32x32xf32>
    %87 = tpu.matmul %78, %86, %cst_37 {dimension_numbers = #tpu.dot_dimension_numbers<[1], [0], [0], [1], [0, 0, 1, 1], [], []>} : vector<32x32xf32>, vector<32x32xf32>, vector<32x32xf32> -> vector<32x32xf32>
    %88 = arith.addf %84, %87 : vector<32x32xf32>
    %c2_38 = arith.constant 2 : index
    %c0_39 = arith.constant 0 : index
    %c0_40 = arith.constant 0 : index
    %89 = vector.load %arg3[%c2_38, %c0_39, %c0_40] : memref<3x32x32xf32, #tpu.memory_space<vmem>>, vector<1x32x32xf32>
    %90 = vector.shape_cast %89 : vector<1x32x32xf32> to vector<32x32xf32>
    %cst_41 = arith.constant dense<0.000000e+00> : vector<32x32xf32>
    %91 = tpu.matmul %78, %90, %cst_41 {dimension_numbers = #tpu.dot_dimension_numbers<[1], [0], [0], [1], [0, 0, 1, 1], [], []>} : vector<32x32xf32>, vector<32x32xf32>, vector<32x32xf32> -> vector<32x32xf32>
    %c31_i32_42 = arith.constant 31 : i32
    %92 = tpu.dynamic_rotate %91 by %c31_i32_42 dim 0 : vector<32x32xf32>, i32 -> vector<32x32xf32>
    %93 = vector.broadcast %24 : vector<32x1xf32> to vector<32x32xf32>
    %94 = arith.mulf %92, %93 : vector<32x32xf32>
    %95 = arith.addf %88, %94 : vector<32x32xf32>
    %c2_43 = arith.constant 2 : index
    %c0_44 = arith.constant 0 : index
    %c0_45 = arith.constant 0 : index
    %96 = vector.load %arg2[%c2_43, %c0_44, %c0_45] : memref<4x32x1xf32, #tpu.memory_space<vmem>>, vector<1x32x1xf32>
    %97 = vector.shape_cast %96 : vector<1x32x1xf32> to vector<32x1xf32>
    %c3 = arith.constant 3 : index
    %c0_46 = arith.constant 0 : index
    %c0_47 = arith.constant 0 : index
    %98 = vector.load %arg2[%c3, %c0_46, %c0_47] : memref<4x32x1xf32, #tpu.memory_space<vmem>>, vector<1x32x1xf32>
    %99 = vector.shape_cast %98 : vector<1x32x1xf32> to vector<32x1xf32>
    %cst_48 = arith.constant dense<0.000000e+00> : vector<32xf32>
    %100 = vector.multi_reduction <add>, %95, %cst_48 [1] : vector<32x32xf32> to vector<32xf32>
    %101 = vector.shape_cast %100 : vector<32xf32> to vector<32x1xf32>
    %102 = arith.mulf %95, %95 : vector<32x32xf32>
    %cst_49 = arith.constant dense<0.000000e+00> : vector<32xf32>
    %103 = vector.multi_reduction <add>, %102, %cst_49 [1] : vector<32x32xf32> to vector<32xf32>
    %104 = vector.shape_cast %103 : vector<32xf32> to vector<32x1xf32>
    %105 = tpu.concatenate %101, %104 in 1 : vector<32x1xf32>, vector<32x1xf32> -> vector<32x2xf32>
    %c16_i32_50 = arith.constant 16 : i32
    %106 = tpu.dynamic_rotate %105 by %c16_i32_50 dim 0 : vector<32x2xf32>, i32 -> vector<32x2xf32>
    %107 = arith.addf %105, %106 : vector<32x2xf32>
    %108 = vector.extract_strided_slice %107 {offsets = [0, 0], sizes = [32, 1], strides = [1, 1]} : vector<32x2xf32> to vector<32x1xf32>
    %cst_51 = arith.constant 1.562500e-02 : f32
    %109 = vector.broadcast %cst_51 : f32 to vector<32x1xf32>
    %110 = arith.mulf %108, %109 : vector<32x1xf32>
    %111 = vector.extract_strided_slice %107 {offsets = [0, 1], sizes = [32, 1], strides = [1, 1]} : vector<32x2xf32> to vector<32x1xf32>
    %cst_52 = arith.constant 1.562500e-02 : f32
    %112 = vector.broadcast %cst_52 : f32 to vector<32x1xf32>
    %113 = arith.mulf %111, %112 : vector<32x1xf32>
    %114 = arith.mulf %110, %110 : vector<32x1xf32>
    %115 = arith.subf %113, %114 : vector<32x1xf32>
    %116 = vector.broadcast %110 : vector<32x1xf32> to vector<32x32xf32>
    %117 = arith.subf %95, %116 : vector<32x32xf32>
    %cst_53 = arith.constant 9.99999974E-6 : f32
    %118 = vector.broadcast %cst_53 : f32 to vector<32x1xf32>
    %119 = arith.addf %115, %118 : vector<32x1xf32>
    %120 = math.rsqrt %119 : vector<32x1xf32>
    %121 = vector.broadcast %120 : vector<32x1xf32> to vector<32x32xf32>
    %122 = arith.mulf %117, %121 : vector<32x32xf32>
    %123 = vector.broadcast %97 : vector<32x1xf32> to vector<32x32xf32>
    %124 = arith.mulf %122, %123 : vector<32x32xf32>
    %125 = vector.broadcast %99 : vector<32x1xf32> to vector<32x32xf32>
    %126 = arith.addf %124, %125 : vector<32x32xf32>
    %cst_54 = arith.constant 0.000000e+00 : f32
    %127 = vector.broadcast %cst_54 : f32 to vector<32x32xf32>
    %128 = arith.cmpf oge, %126, %127 : vector<32x32xf32>
    %cst_55 = arith.constant 2.000000e-01 : f32
    %129 = vector.broadcast %cst_55 : f32 to vector<32x32xf32>
    %130 = arith.mulf %129, %126 : vector<32x32xf32>
    %131 = arith.select %128, %126, %130 : vector<32x32xi1>, vector<32x32xf32>
    %c0_56 = arith.constant 0 : index
    %c0_57 = arith.constant 0 : index
    %132 = vector.load %arg4[%c0_56, %c0_57] : memref<32x32xf32, #tpu.memory_space<vmem>>, vector<32x32xf32>
    tpu.vector_store %arg4[%c0_56, %c0_57], %131 {strides = array<i32>} : memref<32x32xf32, #tpu.memory_space<vmem>>, vector<32x32xf32>,
    return
  }
}

</mosaic_0001>

<bundles_post_ra>
// kernel: block_forward.1
= control target key start
LH: loop header
LB: loop body
LE: loop exit
PB: predicated region body
PF: predicated region fallthrough
CT: control target
= control target key end

     0   :  { %9 = vsyncpa [#allocation3], 0  ;;  %s1190_s0 = inlined_call_operand.vmem [shape: f32[32,32], index: 0, kind: input, shape index: {}]   ;;  %s1191_s1 = inlined_call_operand.vmem [shape: f32[3,32,32], index: 1, kind: input, shape index: {}]   ;;  %s1192_s2 = inlined_call_operand.vmem [shape: f32[4,32,1], index: 2, kind: input, shape index: {}]   ;;  %s1193_s3 = inlined_call_operand.hbm [shape: f32[3,32,32], index: 3, kind: input, shape index: {}]   ;;  %s1194_s4 = inlined_call_operand.hbm [shape: f32[32,32], index: 4, kind: output, shape index: {}]  }
   0x1   :  { %10 = vsyncpa [#allocation4], 0  ;;  %s21_s17 = sshll.u32 %s1193_s3, 4  ;;  %s880_s18 = smov [#allocation2]   ;;  %s22_s17 = int_to_ptr.hbm [resolvable:$true] %s21_s17 }
   0x2   :  { %s23_s19 = sshll.u32 %s880_s18, 4  ;;  %s881_s20 = smov 128   ;;  %s24_s19 = int_to_ptr.vmem [resolvable:$true] %s23_s19 }
   0x3   :  { %s882_s21 = smov 8  }
   0x4   :  { %29 = dma.hbm_to_vmem [thread:$0]  %s22_s17, 1536, %s24_s19, [#allocation3], %s881_s20, %s881_s20, %s882_s21  }
   0x5   :  { %876 = dma.done.wait [#allocation3], 1536  }
   0x6   :  { %877 = vsyncadd [#allocation3], 4294965760  ;;  %v98_v0 = vld [vmem:[%s1191_s1 + $0x18] sm:$0xff]  ;;  %v97_v1 = vld [vmem:[%s1191_s1 + $0x10] sm:$0xff]  ;;  %vm99_vm0 = vcmask 261120   ;;  %v34_v17 = vlaneseq  ;;  %v883_v27 = vmov 0.0  }
   0x7   :  { %v758_v2 = vld [vmem:[%s1191_s1 + $0x38] sm:$0xff]  ;;  %124 = vmatpush.msra.mxu0 %v98_v0  ;;  %795 = vmatpush.msra.mxu2 %v98_v0  ;;  %v757_v3 = vld [vmem:[%s1191_s1 + $0x30] sm:$0xff]  ;;  %v96_v4 = vld [vmem:[%s1191_s1 + $0x8] sm:$0xff]  ;;  %vm280_vm7 = vcmask 7168   ;;  %s734_s9 = sshll.u32 %s1194_s4, 4  ;;  %s735_s9 = int_to_ptr.hbm [resolvable:$true] %s734_s9 }
   0x8   :  { %799 = vmatpush.msra.mxu3 %v758_v2  ;;  %171 = vmatpush.msra.mxu1 %v758_v2  ;;  %v756_v5 = vld [vmem:[%s1191_s1 + $0x28] sm:$0xff]  ;;  %v95_v6 = vld [vmem:[%s1191_s1] sm:$0xff]  ;;  %v93_v8 = vld [vmem:[%s1190_s0 + $0x10] sm:$0xff]  ;;  %v979_v18 = vshrl.u32 %v34_v17, 7 }
   0x9   :  { %125 = vmatpush.msra.mxu0 %v97_v1  ;;  %796 = vmatpush.msra.mxu2 %v97_v1  ;;  %v91_v7 = vld [vmem:[%s1190_s0] sm:$0xff]  ;;  %v766_v9 = vld [vmem:[%s1191_s1 + $0x58] sm:$0xff]  ;;  %v765_v11 = vld [vmem:[%s1191_s1 + $0x50] sm:$0xff] }
   0xa   :  { %800 = vmatpush.msra.mxu3 %v757_v3  ;;  %172 = vmatpush.msra.mxu1 %v757_v3  ;;  %v755_v10 = vld [vmem:[%s1191_s1 + $0x20] sm:$0xff]  ;;  %v764_v12 = vld [vmem:[%s1191_s1 + $0x48] sm:$0xff]  ;;  %v94_v15 = vld [vmem:[%s1190_s0 + $0x18] sm:$0xff]  ;;  %v39_v20 = vand.u32 15, %v979_v18  ;;  %vm145_vm2 = vcmp.lt.s32.totalorder %v979_v18, 1  ;;  %v36_v26 = vadd.s32 8, %v979_v18 }
   0xb   :  { %126 = vmatpush.msra.mxu0 %v96_v4  ;;  %797 = vmatpush.msra.mxu2 %v96_v4  ;;  %v763_v13 = vld [vmem:[%s1191_s1 + $0x40] sm:$0xff]  ;;  %v92_v14 = vld [vmem:[%s1190_s0 + $0x8] sm:$0xff]  ;;  %v37_v30 = vadd.s32 16, %v979_v18  ;;  %vm230_vm3 = vcmp.lt.s32.totalorder %v979_v18, 7  ;;  %v38_v40 = vadd.s32 24, %v979_v18  ;;  %s885_s0 = smov 1  }
   0xc   :  { %801 = vmatpush.msra.mxu3 %v756_v5  ;;  %173 = vmatpush.msra.mxu1 %v756_v5  ;;  %v43_v21 = vadd.s32 4294967295, %v39_v20  ;;  %v40_v32 = vand.u32 15, %v36_v26 }
   0xd   :  { %127 = vmatpush.msra.mxu0 %v95_v6  ;;  %798 = vmatpush.msra.mxu2 %v95_v6  ;;  %v41_v34 = vand.u32 15, %v37_v30  ;;  %v42_v47 = vand.u32 15, %v38_v40 }
   0xe   :  { %751 = vmatmul.msk.f32.vlgmr.msra.gmra.mxu0 %vm99_vm0, %v91_v7  ;;  %753 = vmatmul.msk.f32.vlgmr.msra.gmra.mxu2 %vm99_vm0, %v93_v8  ;;  %vm47_vm1 = vcmp.ge.s32.totalorder %v43_v21, 0  ;;  %v68_v39 = vadd.s32 1, %v40_v32 }
   0xf   :  { %209 = vmatpush.msrb.mxu2 %v766_v9  ;;  %802 = vmatpush.msra.mxu3 %v755_v10  ;;  %v984_v28 = vsel %vm47_vm1, 1.0, %v883_v27  ;;  %v45_v43 = vadd.s32 4294967295, %v41_v34  ;;  %v70_v57 = vadd.s32 1, %v42_v47  ;;  %v773_v47 = vld [vmem:[%s1192_s2 + $0x30] sm:$0xff] }
  0x10   :  { %761 = vmatmul.msk.f32.vlgmr.msra.gmra.mxu3 %vm99_vm0, %v93_v8  ;;  %174 = vmatpush.msra.mxu1 %v755_v10  ;;  %vm76_vm4 = vcmp.lt.s32.totalorder %v68_v39, 16 }
  0x11   :  { %210 = vmatpush.msrb.mxu2 %v765_v11  ;;  %759 = vmatmul.msk.f32.vlgmr.msra.gmra.mxu1 %vm99_vm0, %v91_v7  ;;  %vm49_vm5 = vcmp.ge.s32.totalorder %v45_v43, 0  ;;  %v1003_v55 = vsel %vm76_vm4, 1.0, %v883_v27  ;;  %vm78_vm6 = vcmp.lt.s32.totalorder %v70_v57, 16  ;;  %v243_v43 = vld [vmem:[%s1192_s2] sm:$0xff] }
  0x12   :  { %v1005_v58 = vsel %vm49_vm5, 1.0, %v883_v27  ;;  %v1019_v5 = vsel %vm78_vm6, 1.0, %v883_v27 }
  0x13   :  { %211 = vmatpush.msrb.mxu2 %v764_v12 }
  0x15   :  { %212 = vmatpush.msrb.mxu2 %v763_v13 }
  0x16   :  { %752 = vmatmul.msk.f32.gmra.mxu0 %vm99_vm0, %v92_v14  ;;  %754 = vmatmul.msk.f32.gmra.mxu2 %vm99_vm0, %v94_v15 }
  0x18   :  { %762 = vmatmul.msk.f32.gmra.mxu3 %vm99_vm0, %v94_v15 }
  0x19   :  { %760 = vmatmul.msk.f32.gmra.mxu1 %vm99_vm0, %v92_v14 }
  0x1e   :  { %767 = vmatmul.msk.f32.vlgmr.msrb.gmra.mxu2 %vm99_vm0, %v91_v7 }
  0x26   :  { %768 = vmatmul.msk.f32.gmra.mxu2 %vm99_vm0, %v92_v14 }
  0x2e   :  { %769 = vmatmul.msk.f32.gmra.mxu2 %vm99_vm0, %v93_v8 }
  0x36   :  { %770 = vmatmul.msk.f32.gmra.mxu2 %vm99_vm0, %v94_v15 }
  0x8b   :  { %v129_v22 = vpop.f32.mrf.mxu0 }
  0x8c   :  { %v141_v23 = vrot.slane %v129_v22, 7 }
  0x8e   :  { %v176_v33 = vpop.f32.mrf.mxu1 }
  0x91   :  { %v135_v16 = vpop.f32.mrf.mxu2 }
  0x92   :  { %v143_v52 = vrot.slane %v135_v16, 7 }
  0x93   :  { %v132_v42 = vpop.f32.mrf.mxu0  ;;  %v182_v49 = vpop.f32.mrf.mxu3 }
  0x94   :  { %v142_v48 = vrot.slane %v132_v42, 7 }
  0x96   :  { %v148_v53 = vsel %vm145_vm2, %v141_v23, %v142_v48  ;;  %v179_v54 = vpop.f32.mrf.mxu1  ;;  %v147_v59 = vsel %vm145_vm2, %v142_v48, %v143_v52  ;;  %v772_v48 = vld [vmem:[%s1192_s2 + $0x28] sm:$0xff] }
  0x97   :  { %v189_v61 = vadd.f32 %v179_v54, %v148_v53  ;;  %v152_v63 = vmul.f32 %v1005_v58, %v147_v59 }
  0x99   :  { %v138_v19 = vpop.f32.mrf.mxu2  ;;  %v190_v7 = vadd.f32 %v182_v49, %v152_v63  ;;  %v886_v49 = vmov 1  }
  0x9a   :  { %v144_v24 = vrot.slane %v138_v19, 7 }
  0x9b   :  { %v185_v4 = vpop.f32.mrf.mxu3 }
  0x9c   :  { %v149_v29 = vsel %vm145_vm2, %v144_v24, %v141_v23  ;;  %v146_v3 = vsel %vm145_vm2, %v143_v52, %v144_v24  ;;  %v884_v23 = vmov 0  }
  0x9d   :  { %v150_v31 = vmul.f32 %v984_v28, %v149_v29  ;;  %v191_v10 = vadd.f32 %v185_v4, %v146_v3  ;;  %811 = vset.pattern.permute.xlu1 %v884_v23  ;;  %812 = vset.pattern.permute.xlu0 %v884_v23 }
  0x9e   :  { %813 = vset.pattern.permute.xlu2 %v884_v23 }
  0x9f   :  { %v188_v38 = vadd.f32 %v176_v33, %v150_v31 }
  0xa1   :  { %v214_v25 = vpop.f32.mrf.mxu2 }
  0xa2   :  { %v226_v36 = vrot.slane %v214_v25, 1 }
  0xa9   :  { %v217_v35 = vpop.f32.mrf.mxu2 }
  0xaa   :  { %v227_v37 = vrot.slane %v217_v35, 1 }
  0xac   :  { %v233_v41 = vsel %vm230_vm3, %v226_v36, %v227_v37 }
  0xad   :  { %v994_v44 = vadd.f32 %v233_v41, %v188_v38 }
  0xaf   :  { %v252_v45 = vsel %vm99_vm0, %v994_v44, 0.0  ;;  %v264_v46 = vmul.f32 %v994_v44, %v994_v44 }
  0xb0   :  { %253 = vadd.xlane.f32.xlu0 %v252_v45  ;;  %v244_v45 = vld [vmem:[%s1192_s2 + $0x8] sm:$0xff] }
  0xb1   :  { %v220_v50 = vpop.f32.mrf.mxu2  ;;  %v268_v51 = vsel %vm99_vm0, %v264_v46, 0.0  ;;  %v771_v46 = vld [vmem:[%s1192_s2 + $0x20] sm:$0xff] }
  0xb2   :  { %v228_v56 = vrot.slane %v220_v50, 1  ;;  %269 = vadd.xlane.f32.xlu1 %v268_v51  ;;  %v246_v50 = vld [vmem:[%s1192_s2 + $0x18] sm:$0xff] }
  0xb4   :  { %v232_v60 = vsel %vm230_vm3, %v227_v37, %v228_v56 }
  0xb5   :  { %v236_v62 = vmul.f32 %v1003_v55, %v232_v60 }
  0xb7   :  { %v1013_v0 = vadd.f32 %v236_v62, %v189_v61 }
  0xb9   :  { %v223_v1 = vpop.f32.mrf.mxu2  ;;  %v255_v2 = vsel %vm99_vm0, %v1013_v0, 0.0  ;;  %v265_v19 = vmul.f32 %v1013_v0, %v1013_v0 }
  0xba   :  { %v229_v6 = vrot.slane %v223_v1, 1  ;;  %256 = vadd.xlane.f32.xlu2 %v255_v2 }
  0xbb   :  { %v271_v21 = vsel %vm99_vm0, %v265_v19, 0.0  ;;  %v413_v19 = vld [vmem:[#allocation2 + $0x10] sm:$0xff] }
  0xbc   :  { %v231_v8 = vsel %vm230_vm3, %v228_v56, %v229_v6  ;;  %v234_v9 = vsel %vm230_vm3, %v229_v6, %v226_v36 }
  0xbd   :  { %v238_v11 = vmul.f32 %v1019_v5, %v234_v9  ;;  %v1026_v12 = vadd.f32 %v231_v8, %v190_v7 }
  0xbf   :  { %v258_v13 = vsel %vm99_vm0, %v1026_v12, 0.0  ;;  %v1030_v14 = vadd.f32 %v238_v11, %v191_v10  ;;  %v266_v15 = vmul.f32 %v1026_v12, %v1026_v12  ;;  %v245_v11 = vld [vmem:[%s1192_s2 + $0x10] sm:$0xff] }
  0xc0   :  { %259 = vadd.xlane.f32.xlu0 %v258_v13  ;;  %v774_v13 = vld [vmem:[%s1192_s2 + $0x38] sm:$0xff] }
  0xc1   :  { %v261_v16 = vsel %vm99_vm0, %v1030_v14, 0.0  ;;  %v274_v17 = vsel %vm99_vm0, %v266_v15, 0.0  ;;  %v267_v20 = vmul.f32 %v1030_v14, %v1030_v14  ;;  %v414_v15 = vld [vmem:[#allocation2 + $0x18] sm:$0xff] }
  0xc2   :  { %262 = vadd.xlane.f32.xlu2 %v261_v16  ;;  %275 = vadd.xlane.f32.xlu1 %v274_v17  ;;  %v472_v16 = vld [vmem:[#allocation2 + $0x38] sm:$0xff] }
  0xc3   :  { %v277_v22 = vsel %vm99_vm0, %v267_v20, 0.0  ;;  %v510_v17 = vld [vmem:[#allocation2 + $0x58] sm:$0xff]  ;;  %439 = vmatpush.msrb.mxu3 %v414_v15  ;;  %485 = vmatpush.msrb.mxu0 %v472_v16  ;;  %v471_v20 = vld [vmem:[#allocation2 + $0x30] sm:$0xff] }
  0xc4   :  { %523 = vmatpush.msrb.mxu1 %v510_v17 }
  0xc5   :  { %440 = vmatpush.msrb.mxu3 %v413_v19  ;;  %486 = vmatpush.msrb.mxu0 %v471_v20 }
  0xc8   :  { %272 = vadd.xlane.f32.xlu0 %v271_v21  ;;  %v509_v21 = vld [vmem:[#allocation2 + $0x50] sm:$0xff] }
  0xc9   :  { %524 = vmatpush.msrb.mxu1 %v509_v21 }
  0xca   :  { %278 = vadd.xlane.f32.xlu1 %v277_v22  ;;  %v412_v22 = vld [vmem:[#allocation2 + $0x8] sm:$0xff] }
  0xcb   :  { %441 = vmatpush.msrb.mxu3 %v412_v22 }
 0x123   :  { %v254_v24 = vpop.xlane.xlu0 %253 }
 0x125   :  { %v270_v25 = vpop.xlane.xlu1 %269 }
 0x126   :  { %v281_v30 = vsel %vm280_vm7, %v254_v24, %v270_v25  ;;  %v470_v24 = vld [vmem:[#allocation2 + $0x28] sm:$0xff] }
 0x127   :  { %v508_v25 = vld [vmem:[#allocation2 + $0x48] sm:$0xff]  ;;  %487 = vmatpush.msrb.mxu0 %v470_v24 }
 0x128   :  { %525 = vmatpush.msrb.mxu1 %v508_v25 }
 0x12d   :  { %v257_v26 = vpop.xlane.xlu2 %256 }
 0x133   :  { %v260_v27 = vpop.xlane.xlu0 %259 }
 0x135   :  { %v276_v29 = vpop.xlane.xlu1 %275  ;;  %v263_v36 = vpop.xlane.xlu2 %262 }
 0x136   :  { %v283_v31 = vsel %vm280_vm7, %v260_v27, %v276_v29  ;;  %v469_v27 = vld [vmem:[#allocation2 + $0x20] sm:$0xff] }
 0x137   :  { %v285_v32 = vadd.f32 %v283_v31, %v281_v30  ;;  %v507_v29 = vld [vmem:[#allocation2 + $0x40] sm:$0xff]  ;;  %488 = vmatpush.msrb.mxu0 %v469_v27 }
 0x138   :  { %526 = vmatpush.msrb.mxu1 %v507_v29 }
 0x139   :  { %v287_v33 = vmul.f32 0.015625, %v285_v32 }
 0x13b   :  { %303 = vperm.xlu1 %811, %v287_v33   ;;  %v273_v34 = vpop.xlane.xlu0 %272  ;;  %v289_v35 = vmul.f32 %v287_v33, %v287_v33 }
 0x13c   :  { %v282_v38 = vsel %vm280_vm7, %v257_v26, %v273_v34  ;;  %v411_v26 = vld [vmem:[#allocation2] sm:$0xff] }
 0x13d   :  { %v279_v37 = vpop.xlane.xlu1 %278  ;;  %293 = vrot.lane.b32.xlu2 %v289_v35, %s885_s0  ;;  %442 = vmatpush.msrb.mxu3 %v411_v26 }
 0x13e   :  { %v284_v39 = vsel %vm280_vm7, %v263_v36, %v279_v37 }
 0x13f   :  { %v286_v40 = vadd.f32 %v284_v39, %v282_v38 }
 0x141   :  { %v288_v41 = vmul.f32 0.015625, %v286_v40 }
 0x143   :  { %308 = vperm.xlu1 %811, %v288_v41   ;;  %v290_v42 = vmul.f32 %v288_v41, %v288_v41 }
 0x145   :  { %295 = vrot.lane.b32.xlu0 %v290_v42, %s885_s0  ;;  %377 = vperm.xlu2 %813, %v771_v46  }
 0x14b   :  { %358 = vperm.xlu1 %811, %v244_v45  }
 0x14d   :  { %353 = vperm.xlu0 %812, %v243_v43   ;;  %814 = vset.pattern.permute.xlu2 %v886_v49 }
 0x153   :  { %387 = vperm.xlu1 %811, %v773_v47  }
 0x155   :  { %382 = vperm.xlu0 %812, %v772_v48  }
 0x15d   :  { %368 = vperm.xlu0 %812, %v246_v50  }
 0x197   :  { %v294_v51 = vpop.permute.xlu2 %293 }
 0x198   :  { %v299_v52 = vsub.f32 %v287_v33, %v294_v51 }
 0x19a   :  { %v315_v53 = vadd.f32 1e-05, %v299_v52 }
 0x19c   :  { %820 = vrsqrt.f32 %v315_v53  ;;  %vm323_vm9 = vweird.f32 %v315_v53 }
 0x19f   :  { %v378_v30 = vpop.permute.xlu2 %377 }
 0x1a2   :  { %v821_v54 = vpop.eup %820 }
 0x1a3   :  { %v318_v56 = vmul.f32 %v821_v54, %v315_v53  ;;  %vm324_vm8 = vweird.f32 %v821_v54 }
 0x1a4   :  { %vm325_vm10 = vmor %vm323_vm9, %vm324_vm8 }
 0x1a5   :  { %v319_v57 = vmul.f32 %v821_v54, %v318_v56 }
 0x1a7   :  { %v320_v59 = vmul.f32 0.5, %v319_v57 }
 0x1a9   :  { %v321_v60 = vsub.f32 1.5, %v320_v59 }
 0x1ab   :  { %v322_v61 = vmul.f32 %v821_v54, %v321_v60 }
 0x1ad   :  { %v326_v62 = vsel %vm325_vm10, %v821_v54, %v322_v61  ;;  %v304_v31 = vpop.permute.xlu1 %303 }
 0x1ae   :  { %339 = vperm.xlu2 %814, %v326_v62   ;;  %v311_v32 = vsub.f32 %v994_v44, %v304_v31  ;;  %v313_v48 = vsub.f32 %v1026_v12, %v304_v31 }
 0x1b5   :  { %v309_v40 = vpop.permute.xlu1 %308 }
 0x1b6   :  { %v314_v54 = vsub.f32 %v1030_v14, %v309_v40 }
 0x1b7   :  { %v296_v63 = vpop.permute.xlu0 %295 }
 0x1b8   :  { %v300_v1 = vsub.f32 %v288_v41, %v296_v63  ;;  %v312_v41 = vsub.f32 %v1013_v0, %v309_v40 }
 0x1ba   :  { %v316_v2 = vadd.f32 1e-05, %v300_v1 }
 0x1bc   :  { %822 = vrsqrt.f32 %v316_v2  ;;  %vm333_vm12 = vweird.f32 %v316_v2 }
 0x1bd   :  { %v359_v43 = vpop.permute.xlu1 %358 }
 0x1bf   :  { %v354_v34 = vpop.permute.xlu0 %353 }
 0x1c2   :  { %v823_v3 = vpop.eup %822 }
 0x1c3   :  { %v328_v4 = vmul.f32 %v823_v3, %v316_v2  ;;  %vm334_vm11 = vweird.f32 %v823_v3 }
 0x1c4   :  { %vm335_vm13 = vmor %vm333_vm12, %vm334_vm11 }
 0x1c5   :  { %v329_v6 = vmul.f32 %v823_v3, %v328_v4  ;;  %v388_v0 = vpop.permute.xlu1 %387 }
 0x1c7   :  { %v330_v7 = vmul.f32 0.5, %v329_v6  ;;  %v383_v46 = vpop.permute.xlu0 %382 }
 0x1c9   :  { %v331_v8 = vsub.f32 1.5, %v330_v7 }
 0x1cb   :  { %v332_v9 = vmul.f32 %v823_v3, %v331_v8 }
 0x1cd   :  { %v336_v10 = vsel %vm335_vm13, %v823_v3, %v332_v9 }
 0x1ce   :  { %344 = vperm.xlu2 %814, %v336_v10  }
 0x1cf   :  { %v369_v12 = vpop.permute.xlu0 %368 }
 0x1d6   :  { %815 = vset.pattern.permute.xlu2 %v884_v23 }
 0x1d7   :  { %363 = vperm.xlu2 %815, %v245_v11  }
 0x1df   :  { %392 = vperm.xlu2 %815, %v774_v13  }
 0x208   :  { %v340_v33 = vpop.permute.xlu2 %339 }
 0x209   :  { %v347_v35 = vmul.f32 %v340_v33, %v311_v32  ;;  %v349_v51 = vmul.f32 %v340_v33, %v313_v48 }
 0x20b   :  { %v371_v36 = vmul.f32 %v354_v34, %v347_v35 }
 0x20d   :  { %v395_v37 = vadd.f32 %v378_v30, %v371_v36 }
 0x20f   :  { %v403_v38 = vmul.f32 0.2, %v395_v37  ;;  %vm399_vm14 = vcmp.ge.f32.partialorder %v395_v37, 0.0 }
 0x211   :  { %v407_v39 = vsel %vm399_vm14, %v395_v37, %v403_v38 }
 0x212   :  { %775 = vmatmul.msk.f32.vlgmr.msrb.gmra.mxu3 %vm99_vm0, %v407_v39  ;;  %779 = vmatmul.msk.f32.vlgmr.msrb.gmra.mxu0 %vm99_vm0, %v407_v39 }
 0x213   :  { %783 = vmatmul.msk.f32.vlgmr.msrb.gmra.mxu1 %vm99_vm0, %v407_v39 }
 0x228   :  { %v345_v42 = vpop.permute.xlu2 %344 }
 0x229   :  { %v348_v44 = vmul.f32 %v345_v42, %v312_v41  ;;  %v350_v57 = vmul.f32 %v345_v42, %v314_v54 }
 0x22b   :  { %v372_v45 = vmul.f32 %v359_v43, %v348_v44  ;;  %v374_v61 = vmul.f32 %v369_v12, %v350_v57 }
 0x22d   :  { %v396_v47 = vadd.f32 %v383_v46, %v372_v45 }
 0x22f   :  { %vm400_vm15 = vcmp.ge.f32.partialorder %v396_v47, 0.0  ;;  %v404_v50 = vmul.f32 0.2, %v396_v47 }
 0x231   :  { %v364_v52 = vpop.permute.xlu2 %363  ;;  %v408_v53 = vsel %vm400_vm15, %v396_v47, %v404_v50 }
 0x232   :  { %v373_v56 = vmul.f32 %v364_v52, %v349_v51  ;;  %776 = vmatmul.msk.f32.gmra.mxu3 %vm99_vm0, %v408_v53  ;;  %780 = vmatmul.msk.f32.gmra.mxu0 %vm99_vm0, %v408_v53 }
 0x233   :  { %784 = vmatmul.msk.f32.gmra.mxu1 %vm99_vm0, %v408_v53 }
 0x234   :  { %v397_v59 = vadd.f32 %v388_v0, %v373_v56 }
 0x236   :  { %vm401_vm1 = vcmp.ge.f32.partialorder %v397_v59, 0.0  ;;  %v405_v60 = vmul.f32 0.2, %v397_v59 }
 0x238   :  { %v409_v62 = vsel %vm401_vm1, %v397_v59, %v405_v60 }
 0x239   :  { %v393_v63 = vpop.permute.xlu2 %392 }
 0x23a   :  { %v398_v1 = vadd.f32 %v393_v63, %v374_v61  ;;  %777 = vmatmul.msk.f32.gmra.mxu3 %vm99_vm0, %v409_v62  ;;  %781 = vmatmul.msk.f32.gmra.mxu0 %vm99_vm0, %v409_v62 }
 0x23b   :  { %785 = vmatmul.msk.f32.gmra.mxu1 %vm99_vm0, %v409_v62 }
 0x23c   :  { %v406_v14 = vmul.f32 0.2, %v398_v1  ;;  %vm402_vm4 = vcmp.ge.f32.partialorder %v398_v1, 0.0 }
 0x23e   :  { %v410_v2 = vsel %vm402_vm4, %v398_v1, %v406_v14 }
 0x242   :  { %778 = vmatmul.msk.f32.gmra.mxu3 %vm99_vm0, %v410_v2  ;;  %782 = vmatmul.msk.f32.gmra.mxu0 %vm99_vm0, %v410_v2 }
 0x243   :  { %786 = vmatmul.msk.f32.gmra.mxu1 %vm99_vm0, %v410_v2 }
 0x28f   :  { %v490_v4 = vpop.f32.mrf.mxu0 }
 0x290   :  { %v528_v3 = vpop.f32.mrf.mxu1 }
 0x291   :  { %v540_v34 = vrot.slane %v528_v3, 1 }
 0x295   :  { %v444_v6 = vpop.f32.mrf.mxu3 }
 0x296   :  { %v456_v11 = vrot.slane %v444_v6, 7 }
 0x2af   :  { %v493_v8 = vpop.f32.mrf.mxu0 }
 0x2b0   :  { %v531_v7 = vpop.f32.mrf.mxu1 }
 0x2b1   :  { %v541_v15 = vrot.slane %v531_v7, 1 }
 0x2b3   :  { %v546_v48 = vsel %vm230_vm3, %v540_v34, %v541_v15 }
 0x2b5   :  { %v447_v9 = vpop.f32.mrf.mxu3 }
 0x2b6   :  { %v457_v10 = vrot.slane %v447_v9, 7 }
 0x2b7   :  { %v496_v24 = vpop.f32.mrf.mxu0 }
 0x2b8   :  { %v534_v13 = vpop.f32.mrf.mxu1  ;;  %v462_v16 = vsel %vm145_vm2, %v456_v11, %v457_v10 }
 0x2b9   :  { %v542_v17 = vrot.slane %v534_v13, 1  ;;  %v503_v20 = vadd.f32 %v493_v8, %v462_v16  ;;  %v788_v13 = vld [vmem:[%s1192_s2 + $0x48] sm:$0xff]  ;;  %v789_v16 = vld [vmem:[%s1192_s2 + $0x50] sm:$0xff] }
 0x2bb   :  { %v545_v19 = vsel %vm230_vm3, %v541_v15, %v542_v17  ;;  %v787_v15 = vld [vmem:[%s1192_s2 + $0x40] sm:$0xff] }
 0x2bc   :  { %v549_v21 = vmul.f32 %v1003_v55, %v545_v19  ;;  %v794_v19 = vld [vmem:[%s1192_s2 + $0x78] sm:$0xff] }
 0x2bd   :  { %v450_v22 = vpop.f32.mrf.mxu3 }
 0x2be   :  { %v458_v25 = vrot.slane %v450_v22, 7  ;;  %v1099_v26 = vadd.f32 %v549_v21, %v503_v20 }
 0x2bf   :  { %v499_v40 = vpop.f32.mrf.mxu0 }
 0x2c0   :  { %v461_v27 = vsel %vm145_vm2, %v457_v10, %v458_v25  ;;  %v537_v29 = vpop.f32.mrf.mxu1  ;;  %v569_v30 = vsel %vm99_vm0, %v1099_v26, 0.0  ;;  %v579_v47 = vmul.f32 %v1099_v26, %v1099_v26 }
 0x2c1   :  { %v466_v31 = vmul.f32 %v1005_v58, %v461_v27  ;;  %v543_v32 = vrot.slane %v537_v29, 1  ;;  %570 = vadd.xlane.f32.xlu0 %v569_v30 }
 0x2c3   :  { %v504_v33 = vadd.f32 %v496_v24, %v466_v31  ;;  %v544_v55 = vsel %vm230_vm3, %v542_v17, %v543_v32  ;;  %v547_v37 = vsel %vm230_vm3, %v543_v32, %v540_v34  ;;  %v792_v17 = vld [vmem:[%s1192_s2 + $0x68] sm:$0xff] }
 0x2c4   :  { %v551_v42 = vmul.f32 %v1019_v5, %v547_v37  ;;  %v585_v5 = vsel %vm99_vm0, %v579_v47, 0.0 }
 0x2c5   :  { %v453_v35 = vpop.f32.mrf.mxu3  ;;  %v1108_v36 = vadd.f32 %v544_v55, %v504_v33  ;;  %v790_v55 = vld [vmem:[%s1192_s2 + $0x58] sm:$0xff] }
 0x2c6   :  { %v459_v38 = vrot.slane %v453_v35, 7 }
 0x2c7   :  { %v572_v39 = vsel %vm99_vm0, %v1108_v36, 0.0  ;;  %v580_v56 = vmul.f32 %v1108_v36, %v1108_v36 }
 0x2c8   :  { %v460_v58 = vsel %vm145_vm2, %v458_v25, %v459_v38  ;;  %v463_v41 = vsel %vm145_vm2, %v459_v38, %v456_v11  ;;  %573 = vadd.xlane.f32.xlu2 %v572_v39 }
 0x2c9   :  { %v464_v43 = vmul.f32 %v984_v28, %v463_v41  ;;  %v505_v44 = vadd.f32 %v499_v40, %v460_v58  ;;  %v588_v0 = vsel %vm99_vm0, %v580_v56, 0.0 }
 0x2cb   :  { %v502_v45 = vadd.f32 %v490_v4, %v464_v43  ;;  %v1120_v46 = vadd.f32 %v551_v42, %v505_v44  ;;  %v791_v42 = vld [vmem:[%s1192_s2 + $0x60] sm:$0xff]  ;;  %v793_v43 = vld [vmem:[%s1192_s2 + $0x70] sm:$0xff]  ;;  %s887_s2 = smov [#allocation5]  }
 0x2cc   :  { %s732_s6 = sshll.u32 %s887_s2, 4  ;;  %s733_s6 = int_to_ptr.vmem [resolvable:$true] %s732_s6 }
 0x2cd   :  { %v575_v50 = vsel %vm99_vm0, %v1120_v46, 0.0  ;;  %v1128_v51 = vadd.f32 %v546_v48, %v502_v45  ;;  %v581_v18 = vmul.f32 %v1120_v46, %v1120_v46 }
 0x2ce   :  { %576 = vadd.xlane.f32.xlu1 %v575_v50 }
 0x2cf   :  { %v578_v28 = vmul.f32 %v1128_v51, %v1128_v51  ;;  %v566_v53 = vsel %vm99_vm0, %v1128_v51, 0.0  ;;  %v591_v54 = vsel %vm99_vm0, %v581_v18, 0.0 }
 0x2d0   :  { %586 = vadd.xlane.f32.xlu2 %v585_v5 }
 0x2d1   :  { %v582_v52 = vsel %vm99_vm0, %v578_v28, 0.0 }
 0x2d2   :  { %583 = vadd.xlane.f32.xlu0 %v582_v52 }
 0x2d6   :  { %567 = vadd.xlane.f32.xlu1 %v566_v53 }
 0x2da   :  { %592 = vadd.xlane.f32.xlu0 %v591_v54 }
 0x2de   :  { %589 = vadd.xlane.f32.xlu1 %v588_v0 }
 0x334   :  { %v571_v57 = vpop.xlane.xlu0 %570 }
 0x33b   :  { %v574_v59 = vpop.xlane.xlu2 %573 }
 0x341   :  { %v577_v60 = vpop.xlane.xlu1 %576 }
 0x343   :  { %v587_v62 = vpop.xlane.xlu2 %586 }
 0x344   :  { %v595_v1 = vsel %vm280_vm7, %v571_v57, %v587_v62 }
 0x345   :  { %v584_v12 = vpop.xlane.xlu0 %583 }
 0x349   :  { %v568_v61 = vpop.xlane.xlu1 %567 }
 0x34a   :  { %v594_v6 = vsel %vm280_vm7, %v568_v61, %v584_v12 }
 0x34d   :  { %v593_v63 = vpop.xlane.xlu0 %592 }
 0x34e   :  { %v597_v14 = vsel %vm280_vm7, %v577_v60, %v593_v63 }
 0x34f   :  { %v599_v2 = vadd.f32 %v597_v14, %v595_v1 }
 0x351   :  { %v601_v3 = vmul.f32 0.015625, %v599_v2  ;;  %v590_v4 = vpop.xlane.xlu1 %589 }
 0x352   :  { %v596_v7 = vsel %vm280_vm7, %v574_v59, %v590_v4 }
 0x353   :  { %v598_v8 = vadd.f32 %v596_v7, %v594_v6  ;;  %v603_v9 = vmul.f32 %v601_v3, %v601_v3 }
 0x355   :  { %v600_v10 = vmul.f32 0.015625, %v598_v8  ;;  %608 = vrot.lane.b32.xlu1 %v603_v9, %s885_s0 }
 0x357   :  { %616 = vperm.xlu0 %812, %v600_v10   ;;  %v602_v11 = vmul.f32 %v600_v10, %v600_v10 }
 0x359   :  { %606 = vrot.lane.b32.xlu2 %v602_v11, %s885_s0 }
 0x35d   :  { %671 = vperm.xlu1 %811, %v788_v13  }
 0x35f   :  { %817 = vset.pattern.permute.xlu0 %v886_v49 }
 0x361   :  { %621 = vperm.xlu2 %815, %v601_v3  }
 0x365   :  { %816 = vset.pattern.permute.xlu1 %v886_v49 }
 0x369   :  { %666 = vperm.xlu2 %815, %v787_v15  }
 0x371   :  { %676 = vperm.xlu2 %815, %v789_v16  }
 0x379   :  { %695 = vperm.xlu2 %815, %v792_v17  }
 0x381   :  { %705 = vperm.xlu2 %815, %v794_v19  }
 0x3b3   :  { %v607_v49 = vpop.permute.xlu2 %606 }
 0x3b4   :  { %v612_v20 = vsub.f32 %v600_v10, %v607_v49 }
 0x3b6   :  { %v628_v21 = vadd.f32 1e-05, %v612_v20 }
 0x3b8   :  { %824 = vrsqrt.f32 %v628_v21  ;;  %vm636_vm3 = vweird.f32 %v628_v21 }
 0x3bb   :  { %v622_v44 = vpop.permute.xlu2 %621 }
 0x3bc   :  { %v625_v52 = vsub.f32 %v1099_v26, %v622_v44  ;;  %v627_v53 = vsub.f32 %v1120_v46, %v622_v44 }
 0x3be   :  { %v825_v22 = vpop.eup %824 }
 0x3bf   :  { %v631_v24 = vmul.f32 %v825_v22, %v628_v21  ;;  %vm637_vm2 = vweird.f32 %v825_v22 }
 0x3c0   :  { %vm638_vm5 = vmor %vm636_vm3, %vm637_vm2 }
 0x3c1   :  { %v632_v25 = vmul.f32 %v825_v22, %v631_v24 }
 0x3c3   :  { %v633_v27 = vmul.f32 0.5, %v632_v25  ;;  %v667_v45 = vpop.permute.xlu2 %666 }
 0x3c5   :  { %v634_v29 = vsub.f32 1.5, %v633_v27 }
 0x3c7   :  { %v609_v30 = vpop.permute.xlu1 %608  ;;  %v635_v31 = vmul.f32 %v825_v22, %v634_v29 }
 0x3c8   :  { %v613_v32 = vsub.f32 %v601_v3, %v609_v30 }
 0x3c9   :  { %v639_v33 = vsel %vm638_vm5, %v825_v22, %v635_v31  ;;  %v617_v47 = vpop.permute.xlu0 %616 }
 0x3ca   :  { %v629_v34 = vadd.f32 1e-05, %v613_v32  ;;  %652 = vperm.xlu0 %817, %v639_v33   ;;  %v624_v0 = vsub.f32 %v1128_v51, %v617_v47  ;;  %v626_v3 = vsub.f32 %v1108_v36, %v617_v47 }
 0x3cb   :  { %v677_v48 = vpop.permute.xlu2 %676 }
 0x3cc   :  { %826 = vrsqrt.f32 %v629_v34  ;;  %vm646_vm7 = vweird.f32 %v629_v34 }
 0x3cf   :  { %v672_v50 = vpop.permute.xlu1 %671 }
 0x3d2   :  { %v827_v35 = vpop.eup %826  ;;  %818 = vset.pattern.permute.xlu0 %v884_v23 }
 0x3d3   :  { %v641_v37 = vmul.f32 %v827_v35, %v629_v34  ;;  %681 = vperm.xlu0 %818, %v790_v55   ;;  %vm647_vm6 = vweird.f32 %v827_v35  ;;  %v696_v28 = vpop.permute.xlu2 %695 }
 0x3d4   :  { %vm648_vm8 = vmor %vm646_vm7, %vm647_vm6 }
 0x3d5   :  { %v642_v38 = vmul.f32 %v827_v35, %v641_v37 }
 0x3d7   :  { %v643_v39 = vmul.f32 0.5, %v642_v38 }
 0x3d9   :  { %v644_v40 = vsub.f32 1.5, %v643_v39 }
 0x3db   :  { %v645_v58 = vmul.f32 %v827_v35, %v644_v40  ;;  %v706_v60 = vpop.permute.xlu2 %705 }
 0x3dd   :  { %v649_v41 = vsel %vm648_vm8, %v827_v35, %v645_v58 }
 0x3de   :  { %657 = vperm.xlu1 %816, %v649_v41  }
 0x3e6   :  { %819 = vset.pattern.permute.xlu1 %v884_v23 }
 0x3e7   :  { %690 = vperm.xlu1 %819, %v791_v42  }
 0x3ef   :  { %700 = vperm.xlu1 %819, %v793_v43  }
 0x43c   :  { %v653_v5 = vpop.permute.xlu0 %652 }
 0x43d   :  { %v660_v12 = vmul.f32 %v653_v5, %v624_v0  ;;  %v662_v51 = vmul.f32 %v653_v5, %v626_v3 }
 0x43f   :  { %v684_v14 = vmul.f32 %v667_v45, %v660_v12  ;;  %v686_v8 = vmul.f32 %v677_v48, %v662_v51 }
 0x445   :  { %v682_v54 = vpop.permute.xlu0 %681 }
 0x450   :  { %v658_v18 = vpop.permute.xlu1 %657 }
 0x451   :  { %v661_v23 = vmul.f32 %v658_v18, %v625_v52  ;;  %v663_v56 = vmul.f32 %v658_v18, %v627_v53 }
 0x453   :  { %v685_v57 = vmul.f32 %v672_v50, %v661_v23  ;;  %v687_v59 = vmul.f32 %v682_v54, %v663_v56 }
 0x455   :  { %v709_v61 = vadd.f32 %v696_v28, %v685_v57  ;;  %v711_v62 = vadd.f32 %v706_v60, %v687_v59 }
 0x457   :  { %vm713_vm9 = vcmp.ge.f32.partialorder %v709_v61, 0.0  ;;  %v717_v63 = vmul.f32 0.2, %v709_v61  ;;  %vm715_vm10 = vcmp.ge.f32.partialorder %v711_v62, 0.0  ;;  %v719_v1 = vmul.f32 0.2, %v711_v62 }
 0x459   :  { %v721_v26 = vsel %vm713_vm9, %v709_v61, %v717_v63  ;;  %v723_v2 = vsel %vm715_vm10, %v711_v62, %v719_v1  ;;  %v691_v46 = vpop.permute.xlu1 %690 }
 0x45a   :  { %725 = vst.msk [vmem:[#allocation5 + $0x8] sm:$0xff] %vm99_vm0, %v721_v26  ;;  %v708_v4 = vadd.f32 %v691_v46, %v684_v14 }
 0x45b   :  { %727 = vst.msk [vmem:[#allocation5 + $0x18] sm:$0xff] %vm99_vm0, %v723_v2 }
 0x45c   :  { %vm712_vm11 = vcmp.ge.f32.partialorder %v708_v4, 0.0  ;;  %v716_v6 = vmul.f32 0.2, %v708_v4 }
 0x45e   :  { %v720_v7 = vsel %vm712_vm11, %v708_v4, %v716_v6 }
 0x45f   :  { %724 = vst.msk [vmem:[#allocation5] sm:$0xff] %vm99_vm0, %v720_v7 }
 0x461   :  { %v701_v9 = vpop.permute.xlu1 %700 }
 0x462   :  { %v710_v10 = vadd.f32 %v701_v9, %v686_v8 }
 0x464   :  { %vm714_vm12 = vcmp.ge.f32.partialorder %v710_v10, 0.0  ;;  %v718_v36 = vmul.f32 0.2, %v710_v10 }
 0x466   :  { %v722_v11 = vsel %vm714_vm12, %v710_v10, %v718_v36 }
 0x467   :  { %726 = vst.msk [vmem:[#allocation5 + $0x10] sm:$0xff] %vm99_vm0, %v722_v11 }
 0x468   :  { %740 = dma.vmem_to_hbm [thread:$0]  %s733_s6, 512, %s735_s9, [#allocation4], %s881_s20, %s881_s20, %s882_s21  }
 0x469   :  { %878 = dma.done.wait [#allocation4], 512  }
 0x46a   :  { %879 = vsyncadd [#allocation4], 4294966784 }
 0x46b   :  { %745 = vsyncpa [#allocation3], 1 }
 0x46c   :  { %746 = vsyncpa [#allocation4], 1 }

</bundles_post_ra>
